<compile_context>
chip_gen: v6e
topology: v6e:2x2x1
jax: 0.10.0
libtpu: 0.0.40
codegen_flags: <defaults>
</compile_context>

<pallas_src>
import jax
import jax.numpy as jnp
from jax.experimental import pallas as pl
from jax.experimental.pallas import tpu as pltpu
from math import sqrt


def _round_up(x, m):
    return ((x + m - 1) // m) * m


def _mwlinear_kernel_kfold(tid_ref, x_ref, w_ref, b_ref, o_ref):
    # K folded into the block: one MXU call per (b, n, s) grid step; no scratch.
    # x_ref: (1, tS, K)   w_ref: (1, K, tN)   b_ref: (1, 1, tN)   o_ref: (1, tS, tN)
    acc = jnp.dot(x_ref[0], w_ref[0], preferred_element_type=jnp.float32)
    o_ref[0] = (acc + b_ref[0].astype(jnp.float32)).astype(o_ref.dtype)


def _mwlinear_kernel_ktiled(tid_ref, x_ref, w_ref, b_ref, o_ref, acc_ref):
    # Fallback: K tiled on the innermost ("arbitrary") grid axis.
    # acc_ref: (tS, tN) f32 VMEM scratch, persists across the K axis.
    k = pl.program_id(3)

    @pl.when(k == 0)
    def _():
        # Fold the bias into the accumulator init (no epilogue VPU add).
        acc_ref[...] = jnp.broadcast_to(b_ref[0].astype(jnp.float32), acc_ref.shape)

    acc_ref[...] += jnp.dot(x_ref[0], w_ref[0], preferred_element_type=jnp.float32)

    @pl.when(k == pl.num_programs(3) - 1)
    def _():
        o_ref[0] = acc_ref[...].astype(o_ref.dtype)


def mwlinear(x, taskid, weight, bias=None, *, compute_dtype=None,
             ts_target=512, tn_target=256, tk_target=512, fold_k=None):
    """x: (B, ..., in_f); taskid: (B,) int; weight: (nbias, in_f, out_f);
    bias: (nbias, 1, out_f) or None.

    compute_dtype: optional MXU input dtype (e.g. jnp.bfloat16 — recommended,
    especially on v5e); accumulation stays f32 and the output keeps x.dtype.
    For best performance pass an already-bf16 `weight` so it is not re-cast
    (full nbias*in_f*out_f HBM read+write) on every call.
    fold_k: None = auto (fold whole K into the block when it fits VMEM)."""
    orig_shape = x.shape
    out_dtype = x.dtype
    B = x.shape[0]
    in_f = x.shape[-1]
    nbias, _, out_f = weight.shape

    x2 = x.reshape(B, -1, in_f)
    S = x2.shape[1]

    # Cast only when the dtype actually differs (avoid full-tensor copies).
    if compute_dtype is not None:
        if x2.dtype != compute_dtype:
            x2 = x2.astype(compute_dtype)
        if weight.dtype != compute_dtype:
            weight = weight.astype(compute_dtype)

    if bias is None:
        bias = jnp.zeros((nbias, 1, out_f), dtype=jnp.float32)

    # Guard the data-dependent weight/bias DMA against out-of-range taskid.
    taskid = jnp.clip(taskid.astype(jnp.int32), 0, nbias - 1)

    in_bytes = jnp.dtype(x2.dtype).itemsize
    out_bytes = jnp.dtype(out_dtype).itemsize
    s_mult = 16 if in_bytes == 2 else 8   # bf16 packs 2 rows per sublane

    # VMEM budget derived from the chip (v5e/v6e: 128 MiB, v7x: 64 MiB per TC).
    try:
        vmem_cap = getattr(pltpu.get_tpu_info(), "vmem_capacity_bytes",
                           64 * 1024 * 1024)
    except Exception:  # pragma: no cover - conservative default
        vmem_cap = 64 * 1024 * 1024
    budget = min(int(vmem_cap * 0.6), 48 * 1024 * 1024)

    tS = min(ts_target, _round_up(S, s_mult))
    tN = min(tn_target, _round_up(out_f, 128))
    K_full = _round_up(in_f, 128)

    def footprint(ts_, tk_, tn_, with_acc):
        fp = 2 * (ts_ * tk_ + tk_ * tn_ + tn_) * in_bytes   # double-buffered inputs
        fp += 2 * ts_ * tn_ * out_bytes                      # double-buffered output
        if with_acc:
            fp += ts_ * tn_ * 4                              # f32 accumulator
        return fp

    if fold_k is None:
        fold_k = footprint(tS, K_full, tN, False) <= budget

    if fold_k:
        tK = K_full
    else:
        tK = min(tk_target, K_full)
        # Shrink tiles (multiples of 128 / s_mult) until the working set fits.
        while tK > 128 and footprint(tS, tK, tN, True) > budget:
            tK = max(128, (tK // 2) // 128 * 128)
        while tS > s_mult and footprint(tS, tK, tN, True) > budget:
            tS = max(s_mult, (tS // 2) // s_mult * s_mult)

    S_pad = _round_up(S, tS)
    K_pad = _round_up(in_f, tK)   # may over-pad slightly if tK ∤ K_full (zeros are inert)
    N_pad = _round_up(out_f, tN)

    # Pad only when needed (zero-padding K/N/S is numerically inert).
    if S_pad != S or K_pad != in_f:
        x2 = jnp.pad(x2, ((0, 0), (0, S_pad - S), (0, K_pad - in_f)))
    if K_pad != in_f or N_pad != out_f:
        weight = jnp.pad(weight, ((0, 0), (0, K_pad - in_f), (0, N_pad - out_f)))
    if N_pad != out_f:
        bias = jnp.pad(bias, ((0, 0), (0, 0), (0, N_pad - out_f)))

    fp = footprint(tS, tK, tN, not fold_k)
    vmem_limit = int(min(max(2 * fp, 16 * 1024 * 1024), vmem_cap * 3 // 4))

    if fold_k:
        # Grid (B, N, S): S innermost => weight block (tid[b], 0, n) invariant
        # across s, so its DMA is skipped for consecutive s steps.
        grid = (B, N_pad // tN, S_pad // tS)
        kernel = _mwlinear_kernel_kfold
        in_specs = [
            pl.BlockSpec((1, tS, tK), lambda b, n, s, tid: (b, s, 0)),
            pl.BlockSpec((1, tK, tN), lambda b, n, s, tid: (tid[b], 0, n)),
            pl.BlockSpec((1, 1, tN), lambda b, n, s, tid: (tid[b], 0, n)),
        ]
        out_spec = pl.BlockSpec((1, tS, tN), lambda b, n, s, tid: (b, s, n))
        scratch = []
        semantics = ("parallel", "parallel", "parallel")
    else:
        # K axis innermost + "arbitrary" (accumulator correctness).
        # TODO(synk): if profiling shows exposed DMA here, add
        # pipeline_mode=pl.Buffered(3) on the weight BlockSpec.
        grid = (B, N_pad // tN, S_pad // tS, K_pad // tK)
        kernel = _mwlinear_kernel_ktiled
        in_specs = [
            pl.BlockSpec((1, tS, tK), lambda b, n, s, k, tid: (b, s, k)),
            pl.BlockSpec((1, tK, tN), lambda b, n, s, k, tid: (tid[b], k, n)),
            pl.BlockSpec((1, 1, tN), lambda b, n, s, k, tid: (tid[b], 0, n)),
        ]
        out_spec = pl.BlockSpec((1, tS, tN), lambda b, n, s, k, tid: (b, s, n))
        scratch = [pltpu.VMEM((tS, tN), jnp.float32)]
        semantics = ("parallel", "parallel", "parallel", "arbitrary")

    out = pl.pallas_call(
        kernel,
        out_shape=jax.ShapeDtypeStruct((B, S_pad, N_pad), out_dtype),
        grid_spec=pltpu.PrefetchScalarGridSpec(
            num_scalar_prefetch=1,           # taskid -> SMEM, fed to index_maps
            grid=grid,
            in_specs=in_specs,
            out_specs=out_spec,
            scratch_shapes=scratch,
        ),
        compiler_params=pltpu.CompilerParams(
            dimension_semantics=semantics,
            vmem_limit_bytes=vmem_limit,
        ),
    )(taskid, x2, weight, bias)

    # Slice only when padding was actually applied.
    if S_pad != S or N_pad != out_f:
        out = out[:, :S, :out_f]
    return out.reshape(orig_shape[:-1] + (out_f,))


if __name__ == "__main__":
    key = jax.random.PRNGKey(0)
    kx, kw, kb, kt, kx2, kw2, kt2 = jax.random.split(key, 7)

    # --- Test 1: small shapes, default (K-folded) path, exact f32 semantics ---
    B, S, in_features, out_features, nbias = 2, 8, 32, 32, 3
    x = jax.random.normal(kx, (B, S, in_features), dtype=jnp.float32)
    bound = sqrt(1.0 / in_features)
    weight = jax.random.uniform(kw, (nbias, in_features, out_features),
                                minval=-bound, maxval=bound, dtype=jnp.float32)
    bias = jax.random.normal(kb, (nbias, 1, out_features), dtype=jnp.float32) * 0.1
    taskid = jax.random.randint(kt, (B,), 0, nbias, dtype=jnp.int32)

    ref = jnp.einsum("bsi,bio->bso", x, weight[taskid]) + bias[taskid]

    out = jax.block_until_ready(mwlinear(x, taskid, weight, bias))
    assert out.shape == (B, S, out_features)
    assert jnp.allclose(out, ref, atol=1e-5, rtol=1e-5)

    # --- Test 2: bf16 MXU path on the folded kernel (f32 accumulation) ---
    out_bf16 = jax.block_until_ready(
        mwlinear(x, taskid, weight, bias, compute_dtype=jnp.bfloat16))
    assert jnp.allclose(out_bf16, ref, atol=2e-2, rtol=2e-2)

    # --- Test 3: forced K-tiled fallback path (bias folded into acc init) ---
    B2, S2, in2, out2 = 2, 24, 256, 160
    x2 = jax.random.normal(kx2, (B2, S2, in2), dtype=jnp.float32)
    bound2 = sqrt(1.0 / in2)
    weight2 = jax.random.uniform(kw2, (nbias, in2, out2),
                                 minval=-bound2, maxval=bound2, dtype=jnp.float32)
    bias2 = jnp.zeros((nbias, 1, out2), dtype=jnp.float32)
    taskid2 = jax.random.randint(kt2, (B2,), 0, nbias, dtype=jnp.int32)

    ref2 = jnp.einsum("bsi,bio->bso", x2, weight2[taskid2]) + bias2[taskid2]
    out2_arr = jax.block_until_ready(
        mwlinear(x2, taskid2, weight2, bias2, fold_k=False, tk_target=128))
    assert out2_arr.shape == (B2, S2, out2)
    assert jnp.allclose(out2_arr, ref2, atol=1e-5, rtol=1e-5)

    print("KERNEL_OK")
</pallas_src>

<mosaic_0001>
module attributes {stable_mosaic.version = 11 : i64} {
  func.func @_mwlinear_kernel_kfold(%arg0: i32, %arg1: i32, %arg2: i32, %arg3: memref<2xi32, #tpu.memory_space<smem>>, %arg4: memref<1x8x128xf32, #tpu.memory_space<vmem>>, %arg5: memref<1x128x128xf32, #tpu.memory_space<vmem>>, %arg6: memref<1x1x128xf32, #tpu.memory_space<vmem>>, %arg7: memref<1x8x128xf32, #tpu.memory_space<vmem>>) attributes {dimension_semantics = [#tpu.dimension_semantics<parallel>, #tpu.dimension_semantics<parallel>, #tpu.dimension_semantics<parallel>], iteration_bounds = array<i64: 2, 1, 1>, scalar_prefetch = 1 : i64, scratch_operands = 0 : i64, tpu.core_type = #tpu.core_type<tc>, window_params = [{transform_indices = @transform_0, window_bounds = array<i64: 1, 8, 128>}, {transform_indices = @transform_1, window_bounds = array<i64: 1, 128, 128>}, {transform_indices = @transform_2, window_bounds = array<i64: 1, 1, 128>}, {transform_indices = @transform_3, window_bounds = array<i64: 1, 8, 128>}]} {
    %c0 = arith.constant 0 : index
    %c0_0 = arith.constant 0 : index
    %c0_1 = arith.constant 0 : index
    %0 = vector.load %arg4[%c0, %c0_0, %c0_1] : memref<1x8x128xf32, #tpu.memory_space<vmem>>, vector<1x8x128xf32>
    %1 = vector.shape_cast %0 : vector<1x8x128xf32> to vector<8x128xf32>
    %c0_2 = arith.constant 0 : index
    %c0_3 = arith.constant 0 : index
    %c0_4 = arith.constant 0 : index
    %2 = vector.load %arg5[%c0_2, %c0_3, %c0_4] : memref<1x128x128xf32, #tpu.memory_space<vmem>>, vector<1x128x128xf32>
    %3 = vector.shape_cast %2 : vector<1x128x128xf32> to vector<128x128xf32>
    %cst = arith.constant dense<0.000000e+00> : vector<8x128xf32>
    %4 = tpu.matmul %1, %3, %cst {dimension_numbers = #tpu.dot_dimension_numbers<[1], [0], [0], [1], [0, 0, 1, 1], [], []>} : vector<8x128xf32>, vector<128x128xf32>, vector<8x128xf32> -> vector<8x128xf32>
    %c0_5 = arith.constant 0 : index
    %c0_6 = arith.constant 0 : index
    %c0_7 = arith.constant 0 : index
    %5 = vector.load %arg6[%c0_5, %c0_6, %c0_7] : memref<1x1x128xf32, #tpu.memory_space<vmem>>, vector<1x1x128xf32>
    %6 = vector.shape_cast %5 : vector<1x1x128xf32> to vector<1x128xf32>
    %7 = vector.broadcast %6 : vector<1x128xf32> to vector<8x128xf32>
    %8 = arith.addf %4, %7 : vector<8x128xf32>
    %c0_8 = arith.constant 0 : index
    %c0_9 = arith.constant 0 : index
    %c0_10 = arith.constant 0 : index
    %9 = vector.load %arg7[%c0_8, %c0_9, %c0_10] : memref<1x8x128xf32, #tpu.memory_space<vmem>>, vector<1x8x128xf32>
    %10 = vector.shape_cast %9 : vector<1x8x128xf32> to vector<8x128xf32>
    %11 = vector.shape_cast %8 : vector<8x128xf32> to vector<1x8x128xf32>
    tpu.vector_store %arg7[%c0_8, %c0_9, %c0_10], %11 {strides = array<i32>} : memref<1x8x128xf32, #tpu.memory_space<vmem>>, vector<1x8x128xf32>,
    return
  }
  func.func @transform_0(%arg0: i32, %arg1: i32, %arg2: i32, %arg3: memref<2xi32, #tpu.memory_space<smem>>) -> (i32, i32, i32) {
    %c0_i32 = arith.constant 0 : i32
    %c0_i32_0 = arith.constant 0 : i32
    return %arg0, %arg2, %c0_i32 : i32, i32, i32
  }
  func.func @transform_1(%arg0: i32, %arg1: i32, %arg2: i32, %arg3: memref<2xi32, #tpu.memory_space<smem>>) -> (i32, i32, i32) {
    %0 = arith.index_cast %arg0 : i32 to index
    %1 = memref.load %arg3[%0] : memref<2xi32, #tpu.memory_space<smem>>
    %c0_i32 = arith.constant 0 : i32
    %c0_i32_0 = arith.constant 0 : i32
    return %1, %c0_i32, %arg1 : i32, i32, i32
  }
  func.func @transform_2(%arg0: i32, %arg1: i32, %arg2: i32, %arg3: memref<2xi32, #tpu.memory_space<smem>>) -> (i32, i32, i32) {
    %0 = arith.index_cast %arg0 : i32 to index
    %1 = memref.load %arg3[%0] : memref<2xi32, #tpu.memory_space<smem>>
    %c0_i32 = arith.constant 0 : i32
    %c0_i32_0 = arith.constant 0 : i32
    return %1, %c0_i32, %arg1 : i32, i32, i32
  }
  func.func @transform_3(%arg0: i32, %arg1: i32, %arg2: i32, %arg3: memref<2xi32, #tpu.memory_space<smem>>) -> (i32, i32, i32) {
    %c0_i32 = arith.constant 0 : i32
    return %arg0, %arg2, %arg1 : i32, i32, i32
  }
}

</mosaic_0001>

<bundles_post_ra>
// kernel: tpu_custom_call.1
= control target key start
LH: loop header
LB: loop body
LE: loop exit
PB: predicated region body
PF: predicated region fallthrough
CT: control target
= control target key end

     0   :  { %s875_s15 = smov [#allocation3]   ;;  %s1205_s0 = inlined_call_operand.hbm [shape: s32[2], index: 0, kind: input, shape index: {}]   ;;  %s1206_s1 = inlined_call_operand.hbm [shape: f32[2,8,128], index: 1, kind: input, shape index: {}]   ;;  %s1207_s2 = inlined_call_operand.hbm [shape: f32[3,128,128], index: 2, kind: input, shape index: {}]   ;;  %s1208_s3 = inlined_call_operand.vmem [shape: f32[3,1,128], index: 3, kind: input, shape index: {}]   ;;  %s1209_s4 = inlined_call_operand.hbm [shape: f32[2,8,128], index: 4, kind: output, shape index: {}]  }
   0x1   :  { %10 = dma.hbm_to_smem %s1205_s0, 16, %s875_s15, [#allocation2] }
   0x2   :  { %825 = dma.done.wait [#allocation2], 16 }
   0x3   :  { %826 = vsyncadd [#allocation2], 4294967280 }
   0x4   :  { %12 = sfence }
   0x5   :  { %13 = vsyncpa [#allocation5], 0 }
   0x6   :  { %15 = vsyncpa [#allocation5 + $0x1], 0 }
   0x7   :  { %16 = vsyncpa [#allocation8], 0 }
   0x8   :  { %18 = vsyncpa [#allocation8 + $0x1], 0 }
   0x9   :  { %19 = vsyncpa [#allocation6], 0 }
   0xa   :  { %21 = vsyncpa [#allocation6 + $0x1], 0  ;;  %s911_s18 = smov 0   ;;  %s913_s19 = smov 0  }
   0xb   :  { %s915_s20 = smov 0   ;;  %s917_s21 = smov 0  }
   0xc   :  { %s919_s22 = smov 0   ;;  %s921_s0 = smov 0  }
   0xd   :  { %s923_s23 = smov 0   ;;  %s925_s24 = smov 0  }
   0xe   :  { %s927_s25 = smov 0  }
   0xf LB: > { %1216 = sst [smem:[#allocation16_spill]] %s853_s21  ;;  %s528_s26 = sadd.s32 4294967295, %s873_s25   ;;  %s873_s25 = sphi %s927_s25, %s27_s25   ;;  %s869_s24 = sphi %s925_s24, %s1248_s24   ;;  %s865_s23 = sphi %s923_s23, %s1247_s23   ;;  %s861_s0 = sphi %s921_s0, %s1246_s0   ;;  %s857_s22 = sphi %s919_s22, %s1245_s22   ;;  %s853_s21 = sphi %s917_s21, %s1244_s21   ;;  %s849_s20 = sphi %s915_s20, %s1243_s20   ;;  %s845_s19 = sphi %s913_s19, %s1242_s19   ;;  %s841_s18 = sphi %s911_s18, %s1241_s18  }
  0x10   : > { %s529_s27 = sadd.s32 4294967294, %s873_s25   ;;  %s46_s28 = sadd.s32 1, %s869_s24 }
  0x11   : > { %s55_s29 = sadd.s32 1, %s861_s0  ;;  %p48_p0 = scmp.ge.s32.totalorder %s46_s28, 2 }
  0x12   : > { %p62_p1 = scmp.ne.s32.totalorder %s861_s0, %s857_s22  ;;  %p63_p2 = scmp.eq.s32.totalorder %s873_s25, 0 }
  0x13   : > { %p68_p3 = scmp.ne.s32.totalorder %s857_s22, %s853_s21  ;;  %s1250_s28 = smov (%p48_p0, %s46_s28), 0 }
  0x14   : > { %1217 = sst [smem:[#allocation17_spill]] %s1250_s28  ;;  %p972_p4 = por %p63_p2, %p62_p1 }
  0x15   : > { %p976_p5 = scmp.eq.s32.totalorder %s528_s26, 0  ;;  %s50_s6 = ssub.s32 %s869_s24, %s1250_s28 }
  0x16   : > { %s78_s7 = sld [smem:[#allocation3 + %s869_s24]]  ;;  %p53_p6 = scmp.eq.s32.totalorder %s50_s6, 0 }
  0x17   : > { %p988_p7 = por %p976_p5, %p68_p3  ;;  %s79_s9 = sld [smem:[#allocation3 + %s1250_s28]] }
  0x18   : > { %s85_s10 = sadd.s32 1, %s849_s20  ;;  %p92_p8 = scmp.ne.s32.totalorder %s849_s20, %s845_s19 }
  0x19   : > { %s1220_s8 = scalar_select %p988_p7, 1, 0 }
  0x1a   : > { %s995_s11 = scalar_select %p53_p6, %s861_s0, %s55_s29  }
  0x1b   : > { %p98_p9 = scmp.ne.s32.totalorder %s845_s19, %s841_s18  ;;  %p156_p10 = scmp.eq.s32.totalorder %s528_s26, 1 }
  0x1c   : > { %1221 = sst [smem:[#allocation18_spill]] %s995_s11  ;;  %p162_p11 = scmp.eq.s32.totalorder %s529_s27, 1 }
  0x1d   : > { %p1003_p12 = por %p92_p8, %p63_p2  ;;  %p1009_p13 = por %p98_p9, %p976_p5 }
  0x1e   : > { %p1016_p0 = por %p156_p10, %p62_p1  ;;  %p1023_p6 = por %p162_p11, %p68_p3 }
  0x1f   : > { %s1223_s13 = scalar_select %p1009_p13, 1, 0 }
  0x20   : > { %s1224_s14 = scalar_select %p1016_p0, 1, 0 }
  0x21   : > { %s1225_s15 = scalar_select %p1023_p6, 1, 0 }
  0x22   : > { %s80_s16 = ssub.s32 %s78_s7, %s79_s9  ;;  %p1213_p7 = scmp.lt.s32.totalorder %s873_s25, 2 }
  0x23   : > { %p83_p8 = scmp.eq.s32.totalorder %s80_s16, 0  ;;  %s182_s17 = sand.u32 1, %s861_s0  }
  0x24   : > { %s533_s18 = sshll.u32 %s869_s24, 7  ;;  %s532_s27 = sshll.u32 %s182_s17, 3 }
  0x25   : > { %s1032_s26 = scalar_select %p83_p8, %s849_s20, %s85_s10  }
  0x26   : > { %s192_s6 = scalar_lea.hbm %s1206_s1, %s533_s18  ;;  %s186_s28 = scalar_lea.vmem [#allocation4], %s532_s27 }
  0x27   : > { %s194_s11 = sshll.u32 %s186_s28, 4  ;;  %p1041_p1 = pnand %p1213_p7, %p972_p4  ;;  %s195_s11 = int_to_ptr.vmem [resolvable:$true] %s194_s11 }
  0x28   : > { %p537_p3 = scmp.ge.s32.totalorder %s873_s25, 1  ;;  %p233_p5 = scmp.lt.s32.totalorder %s873_s25, 3 }
  0x29   : > { %s183_s7 = scalar_lea.sflag [#allocation5], %s182_s17  ;;  %p709_p9 = pneg %p1041_p1 }
  0x2a   : > { %s720_s9 = scalar_lea.vmem %s195_s11, 128  ;;  %s876_s10 = smov [#allocation4]  }
  0x2b   : > { %p721_p10 = scmp.ne.s32.totalorder %s195_s11, %s720_s9  ;;  %s725_s16 = sshll.u32 %s876_s10, 4  ;;  %s726_s16 = int_to_ptr.vmem [resolvable:$false] %s725_s16 }
  0x2c   : > { %s727_s28 = scalar_lea.vmem %s726_s16, 256  ;;  %p728_p2 = scmp.lt.s32.totalorder %s195_s11, %s726_s16 }
  0x2d   : > { %p723_p11 = pnand %p721_p10, %p709_p9  ;;  %p729_p4 = scmp.lt.s32.totalorder %s727_s28, %s720_s9 }
  0x2f   : > { %p724_p8 = pneg %p723_p11  ;;  %p730_p7 = por %p729_p4, %p728_p2 }
  0x31   : > { %p731_p6 = pnand %p730_p7, %p724_p8 }
  0x33   : > { %734 = shalt.err (!%p731_p6)
}
  0x34   : > { %610 = dma.hbm_to_vmem [thread:$0]  (!%p1041_p1), %s192_s6, 128, %s195_s11, %s183_s7  }
  0x35   : > { %p1055_p9 = pnand %p537_p3, %p233_p5  ;;  %s201_s17 = sand.u32 1, %s849_s20  }
  0x36   : > { %s534_s18 = sshll.u32 %s201_s17, 7  ;;  %p1228_p7 = scmp.lt.s32.totalorder %s873_s25, 2 }
  0x37   : > { %s1227_s30 = scalar_select %p1055_p9, 1, 0 }
  0x38   : > { %p1064_p6 = pnand %p1228_p7, %p1003_p12  ;;  %p1230_p2 = pmov %p1228_p7 }
  0x39   : > { %s600_s27 = scalar_select %p1003_p12, [#allocation3], [#allocation10] }
  0x3a   : > { %s601_s29 = scalar_select %p1003_p12, %s869_s24, 0 }
  0x3b   : > { %s1252_s27 = smov (!%p1230_p2, %s600_s27), [#allocation11]  ;;  %p1231_p1 = pmov %p1230_p2 }
  0x3c   : > { %s205_s5 = scalar_lea.vmem [#allocation7], %s534_s18  ;;  %s1084_s12 = scalar_lea.sflag [#allocation8], %s201_s17 }
  0x3d   : > { %s1254_s29 = smov (!%p1231_p1, %s601_s29), 0  ;;  %s214_s6 = sshll.u32 %s205_s5, 4  ;;  %s1077_s6 = int_to_ptr.vmem [resolvable:$true] %s214_s6 }
  0x3e   : > { %s206_s11 = sld [smem:[%s1252_s27 + %s1254_s29]]  ;;  %p737_p3 = pneg %p1064_p6 }
  0x3f   : > { %s740_s29 = scalar_lea.hbm %s1207_s2, 6144 }
  0x44   : > { %s546_s7 = sshll.u32 %s206_s11, 11 }
  0x45   : > { %s1082_s16 = scalar_lea.hbm %s1207_s2, %s546_s7 }
  0x46   : > { %s735_s28 = scalar_lea.hbm %s1082_s16, 2048  ;;  %p741_p11 = scmp.lt.s32.totalorder %s1082_s16, %s1207_s2 }
  0x47   : > { %p736_p12 = scmp.ne.s32.totalorder %s1082_s16, %s735_s28  ;;  %p742_p8 = scmp.lt.s32.totalorder %s740_s29, %s735_s28 }
  0x49   : > { %p738_p5 = pnand %p737_p3, %p736_p12  ;;  %p743_p4 = por %p742_p8, %p741_p11 }
  0x4b   : > { %p739_p10 = pneg %p738_p5 }
  0x4d   : > { %p744_p7 = pnand %p743_p4, %p739_p10 }
  0x4f   : > { %747 = shalt.err (!%p744_p7)
}
  0x50   : > { %s748_s17 = scalar_lea.vmem %s1077_s6, 2048  ;;  %s877_s7 = smov [#allocation7]  }
  0x51   : > { %p749_p2 = scmp.ne.s32.totalorder %s1077_s6, %s748_s17  ;;  %s753_s9 = sshll.u32 %s877_s7, 4  ;;  %s754_s9 = int_to_ptr.vmem [resolvable:$false] %s753_s9 }
  0x52   : > { %s755_s10 = scalar_lea.vmem %s754_s9, 4096  ;;  %p756_p5 = scmp.lt.s32.totalorder %s1077_s6, %s754_s9 }
  0x53   : > { %p751_p1 = pnand %p749_p2, %p737_p3  ;;  %p757_p0 = scmp.lt.s32.totalorder %s755_s10, %s748_s17 }
  0x55   : > { %p752_p12 = pneg %p751_p1  ;;  %p758_p13 = por %p757_p0, %p756_p5 }
  0x57   : > { %p759_p9 = pnand %p758_p13, %p752_p12 }
  0x59   : > { %762 = shalt.err (!%p759_p9)
}
  0x5a   : > { %s878_s28 = smov 128   ;;  %s879_s18 = smov 8  }
  0x5b   : > { %615 = dma.hbm_to_vmem [thread:$0]  (!%p1064_p6), %s1082_s16, 2048, %s1077_s6, %s1084_s12, %s878_s28, %s878_s28, %s879_s18  }
  0x5c   : > { %p1232_p3 = scmp.ne.s32.totalorder %s1227_s30, 0 }
  0x5d   : > { %s1108_s27 = sand.u32 (!%p1232_p3), 1, %s857_s22   ;;  %p1233_p13 = scmp.ne.s32.totalorder (!%p1232_p3), %s1220_s8, 0 }
  0x5e   : > { %237 = sbr.rel (%p1232_p3) target bundleno = 345 (0x159), region = 32  ;;  %s538_s29 = sshll.u32 (!%p1232_p3), %s1108_s27, 3 }
  0x5f   : > { %s240_s11 = scalar_lea.sflag (!%p1232_p3), [#allocation5], %s1108_s27  ;;  %s1114_s5 = scalar_lea.vmem (!%p1232_p3), [#allocation4], %s538_s29 }
  0x63   : > { %828 = dma.done.wait (%p1233_p13), %s240_s11, 128  }
  0x64   : > { %830 = vsyncadd (%p1233_p13), %s240_s11, 4294967168  ;;  %s248_s30 = sand.u32 1, %s845_s19   ;;  %p1234_p0 = scmp.ne.s32.totalorder %s1223_s13, 0 }
  0x65   : > { %s539_s21 = sshll.u32 %s248_s30, 7  ;;  %s249_s6 = scalar_lea.sflag [#allocation8], %s248_s30 }
  0x66   : > { %s1121_s16 = scalar_lea.vmem [#allocation7], %s539_s21 }
  0x67   : > { %832 = dma.done.wait (%p1234_p0), %s249_s6, 2048  }
  0x68   : > { %834 = vsyncadd (%p1234_p0), %s249_s6, 4294965248  ;;  %v880_v0 = vmov 0.0   ;;  %vm881_vm0 = vmmov 0   ;;  %v312_v1 = vld [vmem:[%s1121_s16 + $0x78] sm:$0xff]  ;;  %v311_v2 = vld [vmem:[%s1121_s16 + $0x70] sm:$0xff]  ;;  %s288_s8 = sld [smem:[#allocation3 + %s865_s23]] }
  0x69   : > { %564 = vmatprep.subr.mxu0 %v880_v0  ;;  %596 = vmatprep.mubr.msk.f32.mxu0 %vm881_vm0, %v880_v0  ;;  %v310_v3 = vld [vmem:[%s1121_s16 + $0x68] sm:$0xff]  ;;  %v309_v4 = vld [vmem:[%s1121_s16 + $0x60] sm:$0xff]  ;;  %v308_v5 = vld [vmem:[%s1121_s16 + $0x58] sm:$0xff]  ;;  %s543_s7 = sshll.u32 %s865_s23, 7  ;;  %s286_s9 = scalar_lea.vmem [#allocation9], %s538_s29 }
  0x6a   : > { %565 = vmatpush3.msra.mxu0 %v312_v1  ;;  %v307_v6 = vld [vmem:[%s1121_s16 + $0x50] sm:$0xff]  ;;  %v306_v7 = vld [vmem:[%s1121_s16 + $0x48] sm:$0xff]  ;;  %v305_v8 = vld [vmem:[%s1121_s16 + $0x40] sm:$0xff]  ;;  %s407_s10 = sshll.u32 %s286_s9, 4  ;;  %s1154_s11 = scalar_lea.hbm %s1209_s4, %s543_s7  ;;  %s408_s10 = int_to_ptr.vmem [resolvable:$true] %s407_s10 }
  0x6b   : > { %566 = vmatprep.subr.mxu0 %v880_v0  ;;  %v304_v9 = vld [vmem:[%s1121_s16 + $0x38] sm:$0xff]  ;;  %v303_v10 = vld [vmem:[%s1121_s16 + $0x30] sm:$0xff]  ;;  %v302_v11 = vld [vmem:[%s1121_s16 + $0x28] sm:$0xff]  ;;  %s763_s30 = scalar_lea.vmem %s408_s10, 128  ;;  %p1235_p10 = scmp.ne.s32.totalorder %s1224_s14, 0 }
  0x6c   : > { %567 = vmatpush3.msra.mxu0 %v311_v2  ;;  %v301_v12 = vld [vmem:[%s1121_s16 + $0x20] sm:$0xff]  ;;  %v300_v13 = vld [vmem:[%s1121_s16 + $0x18] sm:$0xff]  ;;  %v299_v14 = vld [vmem:[%s1121_s16 + $0x10] sm:$0xff]  ;;  %p764_p6 = scmp.ne.s32.totalorder %s408_s10, %s763_s30  ;;  %s882_s23 = smov [#allocation9]  }
  0x6d   : > { %568 = vmatprep.subr.mxu0 %v880_v0  ;;  %v298_v15 = vld [vmem:[%s1121_s16 + $0x8] sm:$0xff]  ;;  %v297_v16 = vld [vmem:[%s1121_s16] sm:$0xff]  ;;  %v296_v17 = vld [vmem:[%s1114_s5] sm:$0xff]  ;;  %s392_s5 = scalar_lea.sflag [#allocation6], %s1108_s27  ;;  %s767_s21 = sshll.u32 %s882_s23, 4  ;;  %s768_s21 = int_to_ptr.vmem [resolvable:$false] %s767_s21 }
  0x6e   : > { %569 = vmatpush3.msra.mxu0 %v310_v3  ;;  %p289_p9 = scmp.lt.s32.totalorder %s288_s8, 2  ;;  %p765_p11 = pnand %p764_p6, %p1235_p10 }
  0x6f   : > { %570 = vmatprep.subr.mxu0 %v880_v0  ;;  %s769_s29 = scalar_lea.vmem %s768_s21, 256  ;;  %p770_p4 = scmp.lt.s32.totalorder %s408_s10, %s768_s21 }
  0x70   : > { %571 = vmatpush3.msra.mxu0 %v309_v4  ;;  %s1256_s8 = smov (!%p289_p9, %s288_s8), 2  ;;  %p766_p8 = pneg %p765_p11 }
  0x71   : > { %572 = vmatprep.subr.mxu0 %v880_v0  ;;  %s294_s17 = scalar_lea.vmem %s1208_s3, %s1256_s8  ;;  %p771_p7 = scmp.lt.s32.totalorder %s769_s29, %s763_s30 }
  0x72   : > { %573 = vmatpush3.msra.mxu0 %v308_v5  ;;  %v541_v18 = vld [vmem:[%s294_s17] ss:$0 sm:$0xff] }
  0x73   : > { %574 = vmatprep.subr.mxu0 %v880_v0  ;;  %p772_p2 = por %p771_p7, %p770_p4 }
  0x74   : > { %575 = vmatpush3.msra.mxu0 %v307_v6 }
  0x75   : > { %576 = vmatprep.subr.mxu0 %v880_v0  ;;  %p773_p1 = pnand %p772_p2, %p766_p8 }
  0x76   : > { %577 = vmatpush3.msra.mxu0 %v306_v7 }
  0x77   : > { %578 = vmatprep.subr.mxu0 %v880_v0 }
  0x78   : > { %579 = vmatpush3.msra.mxu0 %v305_v8 }
  0x79   : > { %580 = vmatprep.subr.mxu0 %v880_v0 }
  0x7a   : > { %581 = vmatpush3.msra.mxu0 %v304_v9 }
  0x7b   : > { %582 = vmatprep.subr.mxu0 %v880_v0 }
  0x7c   : > { %583 = vmatpush3.msra.mxu0 %v303_v10 }
  0x7d   : > { %584 = vmatprep.subr.mxu0 %v880_v0 }
  0x7e   : > { %585 = vmatpush3.msra.mxu0 %v302_v11 }
  0x7f   : > { %586 = vmatprep.subr.mxu0 %v880_v0 }
  0x80   : > { %587 = vmatpush3.msra.mxu0 %v301_v12 }
  0x81   : > { %588 = vmatprep.subr.mxu0 %v880_v0 }
  0x82   : > { %589 = vmatpush3.msra.mxu0 %v300_v13 }
  0x83   : > { %590 = vmatprep.subr.mxu0 %v880_v0 }
  0x84   : > { %591 = vmatpush3.msra.mxu0 %v299_v14 }
  0x85   : > { %592 = vmatprep.subr.mxu0 %v880_v0 }
  0x86   : > { %593 = vmatpush3.msra.mxu0 %v298_v15 }
  0x87   : > { %594 = vmatprep.subr.mxu0 %v880_v0 }
  0x88   : > { %595 = vmatpush3.msra.mxu0 %v297_v16 }
  0x89   : > { %597 = vmatmul.mubr.f32.vlgmr.msra.gmra.mxu0 %v296_v17 }
 0x149   : > { %v386_v19 = vpop.f32.mrf.mxu0 }
 0x14a   : > { %v387_v20 = vadd.f32 %v541_v18, %v386_v19 }
 0x14b   : > { %v598_v21 = vpop.f32.mrf.mxu0 }
 0x14c   : > { %390 = vst [vmem:[%s286_s9] sm:$0xff] %v387_v20 }
 0x14d   : > { %776 = shalt.err (!%p773_p1)
}
 0x14e   : > { %s777_s6 = scalar_lea.hbm %s1154_s11, 128  ;;  %s781_s8 = scalar_lea.hbm %s1209_s4, 256 }
 0x14f   : > { %p778_p12 = scmp.ne.s32.totalorder %s1154_s11, %s777_s6  ;;  %p782_p13 = scmp.lt.s32.totalorder %s1154_s11, %s1209_s4 }
 0x150   : > { %p783_p0 = scmp.lt.s32.totalorder %s781_s8, %s777_s6 }
 0x151   : > { %p779_p5 = pnand %p778_p12, %p1235_p10 }
 0x152   : > { %p784_p9 = por %p783_p0, %p782_p13 }
 0x153   : > { %p780_p3 = pneg %p779_p5 }
 0x155   : > { %p785_p6 = pnand %p784_p9, %p780_p3 }
 0x157   : > { %788 = shalt.err (!%p785_p6)
}
 0x158   : > { %605 = dma.vmem_to_hbm [thread:$0]  (%p1235_p10), %s408_s10, 128, %s1154_s11, %s392_s5  }
 0x159 PF: > { %s1236_s17 = sld [smem:[#allocation16_spill]]  ;;  %p1237_p11 = scmp.ne.s32.totalorder %s1225_s15, 0 }
 0x15a   : > { %p1238_p8 = scmp.ge.s32.totalorder %s873_s25, 2 }
 0x15c   : > { %p617_p4 = pnand %p1238_p8, %p1237_p11 }
 0x15e   : > { %p618_p7 = pneg %p617_p4 }
 0x15f   : > { %s419_s7 = sand.u32 1, %s1236_s17  }
 0x160   : > { %s420_s9 = scalar_lea.sflag [#allocation6], %s419_s7 }
 0x161   : > { %836 = dma.done.wait (%p618_p7), %s420_s9, 128  }
 0x162   : > { %838 = vsyncadd (%p618_p7), %s420_s9, 4294967168  ;;  %s27_s25 = sadd.s32 1, %s873_s25   ;;  %s1239_s14 = sld [smem:[#allocation18_spill]] }
 0x163   : > { %p24_p2 = scmp.ge.s32.totalorder %s27_s25, 4   ;;  %s1240_s10 = sld [smem:[#allocation17_spill]] }
 0x164   : > { %s1241_s18 = smov %s845_s19  ;;  %s1242_s19 = smov %s849_s20 }
 0x165   : > { %s1243_s20 = smov %s1032_s26  ;;  %s1244_s21 = smov %s857_s22 }
 0x166   : > { %s1245_s22 = smov %s861_s0  ;;  %s1247_s23 = smov %s869_s24 }
 0x167   :  { %26 = sbr.rel (!%p24_p2) target bundleno = 15 (0xf), region = 93 }
 0x168   : > { %s1246_s0 = smov %s1239_s14 }
 0x169   : > { %s1248_s24 = smov %s1240_s10 }
 0x16c   :  { %425 = vsyncpa [#allocation5], 1 }
 0x16d   :  { %427 = vsyncpa [#allocation5 + $0x1], 1 }
 0x16e   :  { %428 = vsyncpa [#allocation8], 1 }
 0x16f   :  { %430 = vsyncpa [#allocation8 + $0x1], 1 }
 0x170   :  { %431 = vsyncpa [#allocation6], 1 }
 0x171   :  { %433 = vsyncpa [#allocation6 + $0x1], 1 }

</bundles_post_ra>
